<compile_context>
chip_gen: v7x
topology: tpu7x:2x2x1
jax: 0.10.0
libtpu: 0.0.40
codegen_flags: <defaults>
</compile_context>

<pallas_src>
import functools

import jax
import jax.numpy as jnp
from jax.experimental import pallas as pl
from jax.experimental.pallas import tpu as pltpu


def _round_up(x: int, m: int) -> int:
    return ((x + m - 1) // m) * m


def _calibrate_kernel(x_ref, w1_ref, b1_ref, w2_ref, nyz_ref, o_ref, *, matmul_dtype):
    # Single MLP chain: tanh(x @ w1 + b1) @ w2 - y_zero   (b2 cancels exactly)
    x = x_ref[...].astype(matmul_dtype)                       # (TILE_B, D)
    w1 = w1_ref[...].astype(matmul_dtype)                     # (D, H_pad)
    h = jnp.tanh(
        jnp.dot(x, w1, preferred_element_type=jnp.float32) + b1_ref[...]
    )                                                         # (TILE_B, H_pad) f32
    w2 = w2_ref[...].astype(matmul_dtype)                     # (H_pad, O_pad)
    y = jnp.dot(h.astype(matmul_dtype), w2, preferred_element_type=jnp.float32)
    # nyz_ref holds -f(zero); broadcast add over the (1, O_pad) row.
    o_ref[...] = (y + nyz_ref[...]).astype(o_ref.dtype)


def make_calibrate(zero, w1, b1, w2, b2, *, tile_b=512, matmul_dtype=jnp.float32):
    """Build a Calibrate forward fn.

    One-time init work (mirrors nn.Module.__init__): pad the hidden and output
    widths to 128 lanes and precompute -f(zero) with the padded weights.
    """
    del b2  # cancels exactly in f(x) - f(zero)
    D, H = w1.shape
    O = w2.shape[1]
    H_pad = _round_up(max(H, 128), 128)
    O_pad = _round_up(max(O, 128), 128)

    # ---- Init-time (cold-path) preparation, done once per instance. ----
    w1_pad = jnp.zeros((D, H_pad), jnp.float32).at[:, :H].set(w1)
    b1_pad = jnp.zeros((1, H_pad), jnp.float32).at[:, :H].set(b1.reshape(1, H))
    w2_pad = jnp.zeros((H_pad, O_pad), jnp.float32).at[:H, :O].set(w2)
    # y_zero computed with the padded weights is exactly equal to the unpadded
    # value (padding contributes tanh(0)=0 times zero rows).  Pre-negate.
    zero2d = zero.reshape(1, D)
    neg_y_zero = -(jnp.tanh(zero2d @ w1_pad + b1_pad) @ w2_pad)   # (1, O_pad)

    kernel = functools.partial(_calibrate_kernel, matmul_dtype=matmul_dtype)

    @jax.jit
    def forward(x):
        B = x.shape[0]
        # Sublane-aligned tile, no bigger than the (padded) batch.
        tb = min(tile_b, _round_up(B, 8))
        B_pad = _round_up(B, tb)
        x_in = x if B_pad == B else jnp.pad(x, ((0, B_pad - B), (0, 0)))

        out = pl.pallas_call(
            kernel,
            out_shape=jax.ShapeDtypeStruct((B_pad, O_pad), jnp.float32),
            grid=(B_pad // tb,),
            in_specs=[
                pl.BlockSpec((tb, D), lambda i: (i, 0)),        # x: tiled over batch
                pl.BlockSpec((D, H_pad), lambda i: (0, 0)),     # w1 (lane-padded)
                pl.BlockSpec((1, H_pad), lambda i: (0, 0)),     # b1 (lane-padded)
                pl.BlockSpec((H_pad, O_pad), lambda i: (0, 0)),  # w2 (lane-padded)
                pl.BlockSpec((1, O_pad), lambda i: (0, 0)),     # -f(zero), precomputed
            ],
            out_specs=pl.BlockSpec((tb, O_pad), lambda i: (i, 0)),
            compiler_params=pltpu.CompilerParams(
                dimension_semantics=("parallel",),
            ),
        )(x_in, w1_pad, b1_pad, w2_pad, neg_y_zero)
        return out[:B, :O]

    return forward


def reference_forward(x, zero, w1, b1, w2, b2):
    def f(v):
        h = jnp.tanh(v @ w1 + b1)
        return h @ w2 + b2
    return f(x) - f(zero)


if __name__ == "__main__":
    # Small dynamics-MLP shapes; B batched so the grid/pipeline is exercised.
    B, D, H, O = 128, 16, 32, 8

    key = jax.random.PRNGKey(0)
    kx, kz, kw1, kb1, kw2, kb2 = jax.random.split(key, 6)

    x = jax.random.normal(kx, (B, D), dtype=jnp.float32)
    zero = jax.random.normal(kz, (1, D), dtype=jnp.float32)       # the `goal` point
    w1 = jax.random.normal(kw1, (D, H), dtype=jnp.float32) * 0.1
    b1 = jax.random.normal(kb1, (1, H), dtype=jnp.float32) * 0.1
    w2 = jax.random.normal(kw2, (H, O), dtype=jnp.float32) * 0.1
    b2 = jax.random.normal(kb2, (1, O), dtype=jnp.float32) * 0.1

    # tile_b=64 -> 2 grid steps over the batch at this demo size.
    calibrate = make_calibrate(zero, w1, b1, w2, b2, tile_b=64)

    out = calibrate(x)
    out = jax.block_until_ready(out)

    ref = reference_forward(x, zero, w1, b1, w2, b2)
    assert out.shape == (B, O)
    assert jnp.allclose(out, ref, atol=1e-5, rtol=1e-5)

    print("KERNEL_OK")
</pallas_src>

<mosaic_0001>
module attributes {stable_mosaic.version = 11 : i64} {
  func.func @_calibrate_kernel(%arg0: i32, %arg1: memref<64x16xf32, #tpu.memory_space<vmem>>, %arg2: memref<16x128xf32, #tpu.memory_space<vmem>>, %arg3: memref<1x128xf32, #tpu.memory_space<vmem>>, %arg4: memref<128x128xf32, #tpu.memory_space<vmem>>, %arg5: memref<1x128xf32, #tpu.memory_space<vmem>>, %arg6: memref<64x128xf32, #tpu.memory_space<vmem>>) attributes {dimension_semantics = [#tpu.dimension_semantics<parallel>], iteration_bounds = array<i64: 2>, scalar_prefetch = 0 : i64, scratch_operands = 0 : i64, tpu.core_type = #tpu.core_type<tc>, window_params = [{transform_indices = @transform_0, window_bounds = array<i64: 64, 16>}, {pipeline_mode = #tpu.pipeline_mode<synchronous>, transform_indices = @transform_1, window_bounds = array<i64: 16, 128>}, {pipeline_mode = #tpu.pipeline_mode<synchronous>, transform_indices = @transform_2, window_bounds = array<i64: 1, 128>}, {pipeline_mode = #tpu.pipeline_mode<synchronous>, transform_indices = @transform_3, window_bounds = array<i64: 128, 128>}, {pipeline_mode = #tpu.pipeline_mode<synchronous>, transform_indices = @transform_4, window_bounds = array<i64: 1, 128>}, {transform_indices = @transform_5, window_bounds = array<i64: 64, 128>}]} {
    %c0 = arith.constant 0 : index
    %c0_0 = arith.constant 0 : index
    %0 = vector.load %arg1[%c0, %c0_0] : memref<64x16xf32, #tpu.memory_space<vmem>>, vector<64x16xf32>
    %c0_1 = arith.constant 0 : index
    %c0_2 = arith.constant 0 : index
    %1 = vector.load %arg2[%c0_1, %c0_2] : memref<16x128xf32, #tpu.memory_space<vmem>>, vector<16x128xf32>
    %cst = arith.constant dense<0.000000e+00> : vector<64x128xf32>
    %2 = tpu.matmul %0, %1, %cst {dimension_numbers = #tpu.dot_dimension_numbers<[1], [0], [0], [1], [0, 0, 1, 1], [], []>} : vector<64x16xf32>, vector<16x128xf32>, vector<64x128xf32> -> vector<64x128xf32>
    %c0_3 = arith.constant 0 : index
    %c0_4 = arith.constant 0 : index
    %3 = vector.load %arg3[%c0_3, %c0_4] : memref<1x128xf32, #tpu.memory_space<vmem>>, vector<1x128xf32>
    %4 = vector.broadcast %3 : vector<1x128xf32> to vector<64x128xf32>
    %5 = arith.addf %2, %4 : vector<64x128xf32>
    %6 = math.tanh %5 : vector<64x128xf32>
    %c0_5 = arith.constant 0 : index
    %c0_6 = arith.constant 0 : index
    %7 = vector.load %arg4[%c0_5, %c0_6] : memref<128x128xf32, #tpu.memory_space<vmem>>, vector<128x128xf32>
    %cst_7 = arith.constant dense<0.000000e+00> : vector<64x128xf32>
    %8 = tpu.matmul %6, %7, %cst_7 {dimension_numbers = #tpu.dot_dimension_numbers<[1], [0], [0], [1], [0, 0, 1, 1], [], []>} : vector<64x128xf32>, vector<128x128xf32>, vector<64x128xf32> -> vector<64x128xf32>
    %c0_8 = arith.constant 0 : index
    %c0_9 = arith.constant 0 : index
    %9 = vector.load %arg5[%c0_8, %c0_9] : memref<1x128xf32, #tpu.memory_space<vmem>>, vector<1x128xf32>
    %10 = vector.broadcast %9 : vector<1x128xf32> to vector<64x128xf32>
    %11 = arith.addf %8, %10 : vector<64x128xf32>
    %c0_10 = arith.constant 0 : index
    %c0_11 = arith.constant 0 : index
    %12 = vector.load %arg6[%c0_10, %c0_11] : memref<64x128xf32, #tpu.memory_space<vmem>>, vector<64x128xf32>
    tpu.vector_store %arg6[%c0_10, %c0_11], %11 {strides = array<i32>} : memref<64x128xf32, #tpu.memory_space<vmem>>, vector<64x128xf32>,
    return
  }
  func.func @transform_0(%arg0: i32) -> (i32, i32) {
    %c0_i32 = arith.constant 0 : i32
    %c0_i32_0 = arith.constant 0 : i32
    return %arg0, %c0_i32 : i32, i32
  }
  func.func @transform_1(%arg0: i32) -> (i32, i32) {
    %c0_i32 = arith.constant 0 : i32
    %c0_i32_0 = arith.constant 0 : i32
    %c0_i32_1 = arith.constant 0 : i32
    return %c0_i32, %c0_i32_0 : i32, i32
  }
  func.func @transform_2(%arg0: i32) -> (i32, i32) {
    %c0_i32 = arith.constant 0 : i32
    %c0_i32_0 = arith.constant 0 : i32
    %c0_i32_1 = arith.constant 0 : i32
    return %c0_i32, %c0_i32_0 : i32, i32
  }
  func.func @transform_3(%arg0: i32) -> (i32, i32) {
    %c0_i32 = arith.constant 0 : i32
    %c0_i32_0 = arith.constant 0 : i32
    %c0_i32_1 = arith.constant 0 : i32
    return %c0_i32, %c0_i32_0 : i32, i32
  }
  func.func @transform_4(%arg0: i32) -> (i32, i32) {
    %c0_i32 = arith.constant 0 : i32
    %c0_i32_0 = arith.constant 0 : i32
    %c0_i32_1 = arith.constant 0 : i32
    return %c0_i32, %c0_i32_0 : i32, i32
  }
  func.func @transform_5(%arg0: i32) -> (i32, i32) {
    %c0_i32 = arith.constant 0 : i32
    %c0_i32_0 = arith.constant 0 : i32
    return %arg0, %c0_i32 : i32, i32
  }
}

</mosaic_0001>

<bundles_post_ra>
// kernel: forward.1
= control target key start
LH: loop header
LB: loop body
LE: loop exit
PB: predicated region body
PF: predicated region fallthrough
CT: control target
= control target key end

     0   :  { %s804_s18 = smov 0   ;;  %s906_s0 = inlined_call_operand.vmem [shape: f32[128,16], index: 0, kind: input, shape index: {}]   ;;  %s907_s1 = inlined_call_operand.vmem [shape: f32[16,128], index: 1, kind: input, shape index: {}]   ;;  %s908_s2 = inlined_call_operand.vmem [shape: f32[1,128], index: 2, kind: input, shape index: {}]   ;;  %s909_s3 = inlined_call_operand.vmem [shape: f32[128,128], index: 3, kind: input, shape index: {}]   ;;  %s910_s4 = inlined_call_operand.vmem [shape: f32[1,128], index: 4, kind: input, shape index: {}]   ;;  %s911_s5 = inlined_call_operand.vmem [shape: f32[128,128], index: 5, kind: output, shape index: {}]  }
   0x1 LB: > { %s575_s19 = sadd.s32 4294967295, %s772_s18   ;;  %p579_p0 = scmp.ge.s32.totalorder %s772_s18, 1  ;;  %s772_s18 = sphi %s804_s18, %s15_s18  }
   0x2   : > { %p188_p1 = scmp.lt.s32.totalorder %s772_s18, 3 }
   0x4   : > { %p189_p2 = pnand %p579_p0, %p188_p1 }
   0x5   : > { %v236_v0 = vld [vmem:[%s907_s1] sm:$0xff] (!%p189_p2)  ;;  %v237_v1 = vld [vmem:[%s907_s1 + $0x8] sm:$0xff] (!%p189_p2)  ;;  %s580_s24 = sshll.u32 (!%p189_p2), %s575_s19, 3  ;;  %v385_v5 = vld [vmem:[%s909_s3 + $0x10] sm:$0xff] (!%p189_p2)  ;;  %vm245_vm0 = vcmask (!%p189_p2), 130048  }
   0x6   : > { %192 = sbr.rel (%p189_p2) target bundleno = 473 (0x1d9), region = 40  ;;  %v383_v2 = vld [vmem:[%s909_s3] sm:$0xff] (!%p189_p2)  ;;  %v690_v3 = vpack.c.bf16 (!%p189_p2), %v237_v1, %v236_v0  ;;  %p217_p3 = scmp.lt.s32.totalorder (!%p189_p2), %s580_s24, 15  ;;  %v384_v4 = vld [vmem:[%s909_s3 + $0x8] sm:$0xff] (!%p189_p2)  ;;  %v386_v6 = vld [vmem:[%s909_s3 + $0x18] sm:$0xff] (!%p189_p2) }
   0x7   : > { %v694_v7 = vpack.c.bf16 (!%p189_p2), %v384_v4, %v383_v2  ;;  %v698_v8 = vpack.c.bf16 (!%p189_p2), %v386_v6, %v385_v5  ;;  %v387_v9 = vld [vmem:[%s909_s3 + $0x20] sm:$0xff] (!%p189_p2)  ;;  %v388_v10 = vld [vmem:[%s909_s3 + $0x28] sm:$0xff] (!%p189_p2)  ;;  %v389_v16 = vld [vmem:[%s909_s3 + $0x30] sm:$0xff] (!%p189_p2) }
   0x8   : > { %691 = vmatprep.subr.bf16.mxu0 (!%p189_p2), %v690_v3  ;;  %v702_v14 = vpack.c.bf16 (!%p189_p2), %v388_v10, %v387_v9  ;;  %v390_v17 = vld [vmem:[%s909_s3 + $0x38] sm:$0xff] (!%p189_p2)  ;;  %v391_v23 = vld [vmem:[%s909_s3 + $0x40] sm:$0xff] (!%p189_p2)  ;;  %v392_v24 = vld [vmem:[%s909_s3 + $0x48] sm:$0xff] (!%p189_p2) }
   0x9   : > { %693 = vmatpush3.bf16.msra.mxu0 (!%p189_p2), %v690_v3  ;;  %726 = vmatprep.subr.bf16.mxu1 (!%p189_p2), %v694_v7  ;;  %v706_v19 = vpack.c.bf16 (!%p189_p2), %v390_v17, %v389_v16  ;;  %v710_v25 = vpack.c.bf16 (!%p189_p2), %v392_v24, %v391_v23  ;;  %v393_v26 = vld [vmem:[%s909_s3 + $0x50] sm:$0xff] (!%p189_p2)  ;;  %v394_v27 = vld [vmem:[%s909_s3 + $0x58] sm:$0xff] (!%p189_p2)  ;;  %v395_v29 = vld [vmem:[%s909_s3 + $0x60] sm:$0xff] (!%p189_p2) }
   0xa   : > { %695 = vmatprep.subr.bf16.mxu0 (!%p189_p2), %v694_v7  ;;  %734 = vmatpush3.bf16.msra.mxu1 (!%p189_p2), %v694_v7  ;;  %v714_v28 = vpack.c.bf16 (!%p189_p2), %v394_v27, %v393_v26  ;;  %v396_v30 = vld [vmem:[%s909_s3 + $0x68] sm:$0xff] (!%p189_p2)  ;;  %v397_v32 = vld [vmem:[%s909_s3 + $0x70] sm:$0xff] (!%p189_p2)  ;;  %v398_v33 = vld [vmem:[%s909_s3 + $0x78] sm:$0xff] (!%p189_p2) }
   0xb   : > { %727 = vmatprep.subr.bf16.mxu1 (!%p189_p2), %v698_v8  ;;  %v718_v31 = vpack.c.bf16 (!%p189_p2), %v396_v30, %v395_v29  ;;  %v722_v34 = vpack.c.bf16 (!%p189_p2), %v398_v33, %v397_v32  ;;  %v584_v35 = vld [vmem:[%s908_s2] ss:$0 sm:$0xff] (!%p189_p2) }
   0xc   : > { %v593_v60 = vld [vmem:[%s910_s4] ss:$0 sm:$0xff] (!%p189_p2) }
   0xd   : > { %s913_s24 = smov (!%p217_p3, %s580_s24), 15 }
   0xe   : > { %s581_s8 = sshll.u32 %s913_s24, 3  ;;  %735 = vmatpush3.bf16.msra.mxu1 %v698_v8 }
   0xf   : > { %s838_s11 = scalar_lea.vmem %s906_s0, %s581_s8  ;;  %728 = vmatprep.subr.bf16.mxu1 %v702_v14  ;;  %s226_s21 = scalar_lea.vmem %s911_s5, %s581_s8 }
  0x10   : > { %v228_v11 = vld [vmem:[%s838_s11] sm:$0xff]  ;;  %v229_v12 = vld [vmem:[%s838_s11 + $0x8] sm:$0xff]  ;;  %v230_v13 = vld [vmem:[%s838_s11 + $0x10] sm:$0xff] }
  0x11   : > { %634 = vmatprep.mubr.msk.f32.mxu0 %vm245_vm0, %v228_v11  ;;  %v231_v15 = vld [vmem:[%s838_s11 + $0x18] sm:$0xff]  ;;  %v232_v18 = vld [vmem:[%s838_s11 + $0x20] sm:$0xff]  ;;  %v233_v20 = vld [vmem:[%s838_s11 + $0x28] sm:$0xff] }
  0x12   : > { %635 = vmatmul.mubr.msk.f32.vlgmr.msra.gmra.mrb[0].mxu0 %vm245_vm0, %v229_v12  ;;  %736 = vmatpush3.bf16.msra.mxu1 %v702_v14  ;;  %v234_v21 = vld [vmem:[%s838_s11 + $0x30] sm:$0xff]  ;;  %v235_v22 = vld [vmem:[%s838_s11 + $0x38] sm:$0xff] }
  0x13   : > { %637 = vmatprep.mubr.msk.f32.mxu0 %vm245_vm0, %v230_v13  ;;  %697 = vmatpush3.bf16.msra.mxu0 %v694_v7 }
  0x14   : > { %699 = vmatprep.subr.bf16.mxu0 %v698_v8  ;;  %729 = vmatprep.subr.bf16.mxu1 %v706_v19 }
  0x16   : > { %638 = vmatmul.mubr.msk.f32.gmra.mrb[2].mxu0 %vm245_vm0, %v231_v15  ;;  %737 = vmatpush3.bf16.msra.mxu1 %v706_v19 }
  0x17   : > { %640 = vmatprep.mubr.msk.f32.mxu0 %vm245_vm0, %v232_v18  ;;  %701 = vmatpush3.bf16.msra.mxu0 %v698_v8 }
  0x18   : > { %703 = vmatprep.subr.bf16.mxu0 %v702_v14  ;;  %730 = vmatprep.subr.bf16.mxu1 %v710_v25 }
  0x1a   : > { %641 = vmatmul.mubr.msk.f32.gmra.mrb[4].mxu0 %vm245_vm0, %v233_v20  ;;  %738 = vmatpush3.bf16.msra.mxu1 %v710_v25 }
  0x1b   : > { %643 = vmatprep.mubr.msk.f32.mxu0 %vm245_vm0, %v234_v21  ;;  %705 = vmatpush3.bf16.msra.mxu0 %v702_v14 }
  0x1c   : > { %707 = vmatprep.subr.bf16.mxu0 %v706_v19  ;;  %731 = vmatprep.subr.bf16.mxu1 %v714_v28 }
  0x1e   : > { %644 = vmatmul.mubr.msk.f32.gmra.mrb[6].mxu0 %vm245_vm0, %v235_v22  ;;  %739 = vmatpush3.bf16.msra.mxu1 %v714_v28 }
  0x1f   : > { %709 = vmatpush3.bf16.msra.mxu0 %v706_v19  ;;  %732 = vmatprep.subr.bf16.mxu1 %v718_v31 }
  0x20   : > { %711 = vmatprep.subr.bf16.mxu0 %v710_v25 }
  0x22   : > { %740 = vmatpush3.bf16.msra.mxu1 %v718_v31 }
  0x23   : > { %713 = vmatpush3.bf16.msra.mxu0 %v710_v25  ;;  %733 = vmatprep.subr.bf16.mxu1 %v722_v34 }
  0x24   : > { %715 = vmatprep.subr.bf16.mxu0 %v714_v28 }
  0x26   : > { %741 = vmatpush3.bf16.msra.mxu1 %v722_v34 }
  0x27   : > { %717 = vmatpush3.bf16.msra.mxu0 %v714_v28 }
  0x28   : > { %719 = vmatprep.subr.bf16.mxu0 %v718_v31 }
  0x2b   : > { %721 = vmatpush3.bf16.msra.mxu0 %v718_v31 }
  0x2c   : > { %723 = vmatprep.subr.bf16.mxu0 %v722_v34 }
  0x2f   : > { %725 = vmatpush3.bf16.msra.mxu0 %v722_v34 }
  0xe5   : > { %v636_v36 = vpop.f32.mrb[0].mxu0 }
  0xe6   : > { %v342_v37 = vadd.f32 %v636_v36, %v584_v35  ;;  %v336_v38 = vpop.f32.mrb[1].mxu0 }
  0xe7   : > { %v337_v39 = vadd.f32 %v584_v35, %v336_v38 }
  0xe9   : > { %750 = vtanh.f32 %v337_v39  ;;  %v639_v40 = vpop.f32.mrb[2].mxu0 }
  0xea   : > { %752 = vtanh.f32 %v342_v37  ;;  %v352_v41 = vadd.f32 %v639_v40, %v584_v35  ;;  %v346_v42 = vpop.f32.mrb[3].mxu0 }
  0xeb   : > { %v347_v43 = vadd.f32 %v584_v35, %v346_v42 }
  0xed   : > { %754 = vtanh.f32 %v347_v43  ;;  %v642_v44 = vpop.f32.mrb[4].mxu0 }
  0xee   : > { %756 = vtanh.f32 %v352_v41  ;;  %v362_v45 = vadd.f32 %v642_v44, %v584_v35  ;;  %v356_v46 = vpop.f32.mrb[5].mxu0 }
  0xef   : > { %v357_v47 = vadd.f32 %v584_v35, %v356_v46 }
  0xf1   : > { %758 = vtanh.f32 %v357_v47  ;;  %v645_v48 = vpop.f32.mrb[6].mxu0 }
  0xf2   : > { %760 = vtanh.f32 %v362_v45  ;;  %v372_v49 = vadd.f32 %v645_v48, %v584_v35  ;;  %v366_v50 = vpop.f32.mrb[7].mxu0 }
  0xf3   : > { %v751_v51 = vpop.eup %750  ;;  %v367_v52 = vadd.f32 %v584_v35, %v366_v50 }
  0xf4   : > { %v753_v53 = vpop.eup %752  ;;  %678 = vmatprep.mubr.f32.mxu0 %v751_v51 }
  0xf5   : > { %762 = vtanh.f32 %v367_v52  ;;  %679 = vmatmul.mubr.f32.vlgmr.msra.gmra.mrb[8].mxu0 %v753_v53 }
  0xf6   : > { %764 = vtanh.f32 %v372_v49 }
  0xf7   : > { %v755_v54 = vpop.eup %754 }
  0xf8   : > { %v757_v55 = vpop.eup %756  ;;  %681 = vmatprep.mubr.f32.mxu1 %v755_v54 }
  0xf9   : > { %682 = vmatmul.mubr.f32.vlgmr.msra.gmra.mrb[0].mxu1 %v757_v55 }
  0xfb   : > { %v759_v56 = vpop.eup %758 }
  0xfc   : > { %v761_v57 = vpop.eup %760  ;;  %684 = vmatprep.mubr.f32.mxu1 %v759_v56 }
  0xfd   : > { %685 = vmatmul.mubr.f32.gmra.mrb[2].mxu1 %v761_v57 }
  0xff   : > { %v763_v58 = vpop.eup %762 }
 0x100   : > { %v765_v59 = vpop.eup %764  ;;  %687 = vmatprep.mubr.f32.mxu1 %v763_v58 }
 0x101   : > { %688 = vmatmul.mubr.f32.gmra.mrb[4].mxu1 %v765_v59 }
 0x1c8   : > { %v680_v61 = vpop.f32.mrb[8].mxu0 }
 0x1c9   : > { %v478_v62 = vadd.f32 %v680_v61, %v593_v60  ;;  %v472_v63 = vpop.f32.mrb[9].mxu0 }
 0x1ca   : > { %v473_v0 = vadd.f32 %v593_v60, %v472_v63 }
 0x1cb   : > { %512 = vst [vmem:[%s226_s21 + $0x8] sm:$0xff] %v478_v62 }
 0x1cc   : > { %511 = vst [vmem:[%s226_s21] sm:$0xff] %v473_v0  ;;  %v683_v1 = vpop.f32.mrb[0].mxu1 }
 0x1cd   : > { %v488_v2 = vadd.f32 %v683_v1, %v593_v60  ;;  %v482_v3 = vpop.f32.mrb[1].mxu1 }
 0x1ce   : > { %v483_v4 = vadd.f32 %v593_v60, %v482_v3 }
 0x1cf   : > { %514 = vst [vmem:[%s226_s21 + $0x18] sm:$0xff] %v488_v2 }
 0x1d0   : > { %513 = vst [vmem:[%s226_s21 + $0x10] sm:$0xff] %v483_v4  ;;  %v686_v5 = vpop.f32.mrb[2].mxu1 }
 0x1d1   : > { %v498_v6 = vadd.f32 %v686_v5, %v593_v60  ;;  %v492_v7 = vpop.f32.mrb[3].mxu1 }
 0x1d2   : > { %v493_v8 = vadd.f32 %v593_v60, %v492_v7 }
 0x1d3   : > { %516 = vst [vmem:[%s226_s21 + $0x28] sm:$0xff] %v498_v6 }
 0x1d4   : > { %515 = vst [vmem:[%s226_s21 + $0x20] sm:$0xff] %v493_v8  ;;  %v689_v9 = vpop.f32.mrb[4].mxu1 }
 0x1d5   : > { %v508_v10 = vadd.f32 %v689_v9, %v593_v60  ;;  %v502_v11 = vpop.f32.mrb[5].mxu1 }
 0x1d6   : > { %v503_v12 = vadd.f32 %v593_v60, %v502_v11 }
 0x1d7   : > { %518 = vst [vmem:[%s226_s21 + $0x38] sm:$0xff] %v508_v10 }
 0x1d8   : > { %517 = vst [vmem:[%s226_s21 + $0x30] sm:$0xff] %v503_v12 }
 0x1d9 PF: > { %s15_s18 = sadd.s32 1, %s772_s18  }
 0x1da   : > { %p12_p4 = scmp.ge.s32.totalorder %s15_s18, 4  }
 0x1dc   :  { %14 = sbr.rel (!%p12_p4) target bundleno = 1 (0x1), region = 70 }

</bundles_post_ra>
